<compile_context>
chip_gen: v6e
topology: v6e:2x2x1
jax: 0.10.0
libtpu: 0.0.40
codegen_flags: <defaults>
</compile_context>

<pallas_src>
import jax
import jax.numpy as jnp
from jax.experimental import pallas as pl
from jax.experimental.pallas import tpu as pltpu


def _round_up(x, m):
    return (x + m - 1) // m * m


# ---------------------------------------------------------------------------
# Kernel body: one row tile of (rows, Cin) activations x resident (Cin, Cout)
# weight + bias.  rows = N*H*W (channels-last), lane dim = Cout.
# Cin/Cout are tiny in the demo, so the MXU is under-utilized, but the matmul
# cost is hidden under the DMA in this memory-bound kernel.
# ---------------------------------------------------------------------------
def _channel_mix_kernel(x_ref, w_ref, b_ref, o_ref):
    o_ref[...] = (
        jnp.dot(x_ref[...], w_ref[...], preferred_element_type=jnp.float32)
        + b_ref[...]
    ).astype(o_ref.dtype)


def _row_tiled_channel_mix(x_rows, w, b, *, tile_m=1024):
    """Tiled, pipelined pointwise channel mix: (rows, Cin) @ (Cin, Cout) + b."""
    rows, cin = x_rows.shape
    cout = w.shape[1]
    # Pick the largest sublane-aligned tile that is useful; ~1K rows is near
    # the measured HBM-roofline sweet spot, smaller tiles for tiny inputs.
    tile_m = min(tile_m, _round_up(rows, 8))
    grid = (pl.cdiv(rows, tile_m),)

    # VMEM budget: double-buffered x and out tiles + resident w/b (+ headroom).
    itemsize = jnp.dtype(x_rows.dtype).itemsize
    vmem_need = itemsize * (2 * tile_m * cin + 2 * tile_m * cout + cin * cout + 8 * cout)
    vmem_limit = int(min(48 * 1024 * 1024, max(2 * 1024 * 1024, 2 * vmem_need)))

    cost = pl.CostEstimate(
        flops=2 * rows * cin * cout,
        transcendentals=0,
        bytes_accessed=itemsize * (rows * cin + rows * cout + cin * cout + cout),
    )

    return pl.pallas_call(
        _channel_mix_kernel,
        out_shape=jax.ShapeDtypeStruct((rows, cout), x_rows.dtype),
        grid_spec=pltpu.PrefetchScalarGridSpec(
            num_scalar_prefetch=0,
            grid=grid,
            in_specs=[
                pl.BlockSpec((tile_m, cin), lambda i: (i, 0)),   # streamed rows
                pl.BlockSpec((cin, cout), lambda i: (0, 0)),     # resident weight
                pl.BlockSpec((1, cout), lambda i: (0, 0)),       # resident bias
            ],
            out_specs=pl.BlockSpec((tile_m, cout), lambda i: (i, 0)),
        ),
        compiler_params=pltpu.CompilerParams(
            dimension_semantics=("parallel",),   # shard rows across TCs (v7x)
            vmem_limit_bytes=vmem_limit,
        ),
        cost_estimate=cost,
    )(x_rows, w, b.reshape(1, cout))


# ---------------------------------------------------------------------------
# Branch module: 1x1 conv (channel mix) + optional symmetric spatial trim.
# NCHW in / NCHW out (module contract); kernel works channels-last internally.
# ---------------------------------------------------------------------------
class PointwiseConvBranch:
    def __init__(self, weight, bias, trim=0):
        self.weight = weight          # (Cin, Cout)
        self.bias = bias              # (Cout,)
        self.trim = int(trim)         # symmetric spatial trim per side

    def __call__(self, x_nchw):
        n, c, h, w = x_nchw.shape
        t = self.trim
        hh, ww = h - 2 * t, w - 2 * t
        # Single relayout in (transpose + crop fuse into one XLA copy).
        x_rows = jnp.transpose(x_nchw, (0, 2, 3, 1))
        if t:
            x_rows = x_rows[:, t:t + hh, t:t + ww, :]
        x_rows = x_rows.reshape(n * hh * ww, c)
        y_rows = _row_tiled_channel_mix(x_rows, self.weight, self.bias)
        # Single relayout out, required because the module contract is NCHW.
        return jnp.transpose(
            y_rows.reshape(n, hh, ww, self.weight.shape[1]), (0, 3, 1, 2)
        )


# ---------------------------------------------------------------------------
# Concat module equivalent.
# ---------------------------------------------------------------------------
class ConcatPallas:
    def __init__(self, dim, modules):
        self.dim = dim
        self._modules = dict(modules)

    def __len__(self):
        return len(self._modules)

    def __call__(self, x):
        branches = list(self._modules.values())
        if self.dim == 1 and branches and all(
            isinstance(m, PointwiseConvBranch) for m in branches
        ):
            return self._fused_forward(x, branches)

        # Generic fallback (arbitrary branch modules): run each branch, then
        # center-crop + concat.  A standalone crop+concat Pallas kernel is a
        # pure HBM round trip (per review), so it is intentionally left to XLA.
        # TODO(synk): for non-pointwise Pallas branches, write each branch's
        # tiles directly into its channel slice of the output via out BlockSpec
        # index_maps instead of a post-hoc concat.
        outs = [m(x) for m in branches]
        h_min = min(int(o.shape[2]) for o in outs)
        w_min = min(int(o.shape[3]) for o in outs)
        cropped = []
        for o in outs:
            d2 = (int(o.shape[2]) - h_min) // 2
            d3 = (int(o.shape[3]) - w_min) // 2
            cropped.append(o[:, :, d2:d2 + h_min, d3:d3 + w_min])
        return jnp.concatenate(cropped, axis=self.dim)

    def _fused_forward(self, x, branches):
        # Every branch is a pointwise conv with a symmetric trim t_i.  After the
        # Concat center-crop, branch i's output at (p, q) reads the input at
        # (p + t_max, q + t_max) for ALL i, so crop + concat collapses into one
        # pointwise conv with concatenated weights on the center-cropped input.
        n, cin, h, w = x.shape
        t_max = max(m.trim for m in branches)
        h_min, w_min = h - 2 * t_max, w - 2 * t_max
        w_cat = jnp.concatenate([m.weight for m in branches], axis=1)   # (Cin, C_total)
        b_cat = jnp.concatenate([m.bias for m in branches], axis=0)     # (C_total,)
        c_total = int(w_cat.shape[1])

        # One relayout: NCHW -> cropped channels-last rows (activations are
        # streamed from HBM exactly once; no per-branch transposes, no concat
        # kernel, no extra output round trip).
        x_rows = (
            jnp.transpose(x, (0, 2, 3, 1))[
                :, t_max:t_max + h_min, t_max:t_max + w_min, :
            ].reshape(n * h_min * w_min, cin)
        )
        y_rows = _row_tiled_channel_mix(x_rows, w_cat, b_cat)
        # Channel concat already happened in lane order; transpose back to NCHW.
        return jnp.transpose(
            y_rows.reshape(n, h_min, w_min, c_total), (0, 3, 1, 2)
        )


if __name__ == "__main__":
    key = jax.random.PRNGKey(0)
    k_x, k_w1, k_b1, k_w2, k_b2 = jax.random.split(key, 5)

    N, CIN, H, W = 2, 4, 16, 16
    C1, C2 = 3, 5

    x = jax.random.normal(k_x, (N, CIN, H, W), dtype=jnp.float32)

    # Deterministic synthetic branch parameters.
    w1 = jax.random.normal(k_w1, (CIN, C1), dtype=jnp.float32) * 0.1
    b1 = jax.random.normal(k_b1, (C1,), dtype=jnp.float32) * 0.1
    w2 = jax.random.normal(k_w2, (CIN, C2), dtype=jnp.float32) * 0.1
    b2 = jax.random.normal(k_b2, (C2,), dtype=jnp.float32) * 0.1

    # Branch A: 1x1 conv, spatial preserved (H, W).
    # Branch B: 1x1 conv + "valid"-style trim -> (H-2, W-2), exercising the
    # Concat center-crop path.
    branch_a = PointwiseConvBranch(w1, b1, trim=0)
    branch_b = PointwiseConvBranch(w2, b2, trim=1)

    model = ConcatPallas(dim=1, modules={"a": branch_a, "b": branch_b})
    out = jax.block_until_ready(model(x))

    # Also exercise the standalone (un-fused) tiled branch kernel once.
    ya_pallas = jax.block_until_ready(branch_a(x))

    # Pure-JAX reference of the PyTorch forward semantics.
    ya = jnp.einsum("nchw,cd->ndhw", x, w1) + b1[None, :, None, None]
    yb = (jnp.einsum("nchw,cd->ndhw", x, w2) + b2[None, :, None, None])[:, :, 1:-1, 1:-1]
    h_min = min(ya.shape[2], yb.shape[2])
    w_min = min(ya.shape[3], yb.shape[3])
    crops = []
    for t in (ya, yb):
        d2 = (t.shape[2] - h_min) // 2
        d3 = (t.shape[3] - w_min) // 2
        crops.append(t[:, :, d2:d2 + h_min, d3:d3 + w_min])
    ref = jnp.concatenate(crops, axis=1)

    assert out.shape == (N, C1 + C2, H - 2, W - 2), out.shape
    assert jnp.allclose(out, ref, atol=1e-5, rtol=1e-5), "fused concat mismatch"
    assert jnp.allclose(ya_pallas, ya, atol=1e-5, rtol=1e-5), "branch kernel mismatch"
    print("KERNEL_OK")
</pallas_src>

<mosaic_0001>
module attributes {stable_mosaic.version = 11 : i64} {
  func.func @_channel_mix_kernel(%arg0: i32, %arg1: memref<392x4xf32, #tpu.memory_space<vmem>>, %arg2: memref<4x8xf32, #tpu.memory_space<vmem>>, %arg3: memref<1x8xf32, #tpu.memory_space<vmem>>, %arg4: memref<392x8xf32, #tpu.memory_space<vmem>>) attributes {dimension_semantics = [#tpu.dimension_semantics<parallel>], iteration_bounds = array<i64: 1>, scalar_prefetch = 0 : i64, scratch_operands = 0 : i64, tpu.core_type = #tpu.core_type<tc>, window_params = [{transform_indices = @transform_0, window_bounds = array<i64: 392, 4>}, {pipeline_mode = #tpu.pipeline_mode<synchronous>, transform_indices = @transform_1, window_bounds = array<i64: 4, 8>}, {pipeline_mode = #tpu.pipeline_mode<synchronous>, transform_indices = @transform_2, window_bounds = array<i64: 1, 8>}, {transform_indices = @transform_3, window_bounds = array<i64: 392, 8>}]} {
    %c0 = arith.constant 0 : index
    %c0_0 = arith.constant 0 : index
    %0 = vector.load %arg1[%c0, %c0_0] : memref<392x4xf32, #tpu.memory_space<vmem>>, vector<392x4xf32>
    %c0_1 = arith.constant 0 : index
    %c0_2 = arith.constant 0 : index
    %1 = vector.load %arg2[%c0_1, %c0_2] : memref<4x8xf32, #tpu.memory_space<vmem>>, vector<4x8xf32>
    %cst = arith.constant dense<0.000000e+00> : vector<392x8xf32>
    %2 = tpu.matmul %0, %1, %cst {dimension_numbers = #tpu.dot_dimension_numbers<[1], [0], [0], [1], [0, 0, 1, 1], [], []>} : vector<392x4xf32>, vector<4x8xf32>, vector<392x8xf32> -> vector<392x8xf32>
    %c0_3 = arith.constant 0 : index
    %c0_4 = arith.constant 0 : index
    %3 = vector.load %arg3[%c0_3, %c0_4] : memref<1x8xf32, #tpu.memory_space<vmem>>, vector<1x8xf32>
    %4 = vector.broadcast %3 : vector<1x8xf32> to vector<392x8xf32>
    %5 = arith.addf %2, %4 : vector<392x8xf32>
    %c0_5 = arith.constant 0 : index
    %c0_6 = arith.constant 0 : index
    %6 = vector.load %arg4[%c0_5, %c0_6] : memref<392x8xf32, #tpu.memory_space<vmem>>, vector<392x8xf32>
    tpu.vector_store %arg4[%c0_5, %c0_6], %5 {strides = array<i32>} : memref<392x8xf32, #tpu.memory_space<vmem>>, vector<392x8xf32>,
    return
  }
  func.func @transform_0(%arg0: i32) -> (i32, i32) {
    %c0_i32 = arith.constant 0 : i32
    %c0_i32_0 = arith.constant 0 : i32
    return %arg0, %c0_i32 : i32, i32
  }
  func.func @transform_1(%arg0: i32) -> (i32, i32) {
    %c0_i32 = arith.constant 0 : i32
    %c0_i32_0 = arith.constant 0 : i32
    %c0_i32_1 = arith.constant 0 : i32
    return %c0_i32, %c0_i32_0 : i32, i32
  }
  func.func @transform_2(%arg0: i32) -> (i32, i32) {
    %c0_i32 = arith.constant 0 : i32
    %c0_i32_0 = arith.constant 0 : i32
    %c0_i32_1 = arith.constant 0 : i32
    return %c0_i32, %c0_i32_0 : i32, i32
  }
  func.func @transform_3(%arg0: i32) -> (i32, i32) {
    %c0_i32 = arith.constant 0 : i32
    %c0_i32_0 = arith.constant 0 : i32
    return %arg0, %c0_i32 : i32, i32
  }
}

</mosaic_0001>

<bundles_post_ra>
// kernel: tpu_custom_call.1
= control target key start
LH: loop header
LB: loop body
LE: loop exit
PB: predicated region body
PF: predicated region fallthrough
CT: control target
= control target key end

     0   :  { %vm219_vm0 = vcmask 1043456   ;;  %vm71_vm1 = vcmask 31744   ;;  %v841_v0 = vmov 0.0   ;;  %vm842_vm2 = vmmov 0   ;;  %s1412_s1 = inlined_call_operand.vmem [shape: f32[4,8], index: 1, kind: input, shape index: {}]   ;;  %s1413_s0 = inlined_call_operand.vmem [shape: f32[392,4], index: 0, kind: input, shape index: {}]   ;;  %s1414_s2 = inlined_call_operand.vmem [shape: f32[1,8], index: 2, kind: input, shape index: {}]   ;;  %s1415_s3 = inlined_call_operand.vmem [shape: f32[392,8], index: 3, kind: output, shape index: {}]  }
   0x1   :  { %688 = vmatprep.subr.mxu0 %v841_v0  ;;  %v63_v1 = vld [vmem:[%s1412_s1] sm:$0xf]  ;;  %690 = vmatprep.mubr.msk.f32.mxu0 %vm842_vm2, %v841_v0  ;;  %v39_v3 = vld [vmem:[%s1413_s0 + $0xc8] sm:$0xff]  ;;  %v40_v5 = vld [vmem:[%s1413_s0 + $0xd0] sm:$0xff]  ;;  %vm533_vm3 = vcmask 64512  }
   0x2   :  { %v14_v2 = vld [vmem:[%s1413_s0] sm:$0xff]  ;;  %689 = vmatpush3.msk.msra.mxu0 %vm219_vm0, %v63_v1  ;;  %837 = vmatprep.subr.mxu1 %v841_v0  ;;  %v15_v4 = vld [vmem:[%s1413_s0 + $0x8] sm:$0xff]  ;;  %v16_v6 = vld [vmem:[%s1413_s0 + $0x10] sm:$0xff] }
   0x3   :  { %691 = vmatmul.mubr.msk.f32.vlgmr.msra.gmra.mxu0 %vm71_vm1, %v14_v2  ;;  %838 = vmatpush3.msk.msra.mxu1 %vm219_vm0, %v63_v1  ;;  %v41_v7 = vld [vmem:[%s1413_s0 + $0xd8] sm:$0xff]  ;;  %v42_v9 = vld [vmem:[%s1413_s0 + $0xe0] sm:$0xff]  ;;  %v43_v11 = vld [vmem:[%s1413_s0 + $0xe8] sm:$0xff] }
   0x4   :  { %765 = vmatprep.mubr.msk.f32.mxu1 %vm842_vm2, %v841_v0  ;;  %693 = vmatprep.mubr.msk.f32.mxu0 %vm842_vm2, %v841_v0  ;;  %v17_v8 = vld [vmem:[%s1413_s0 + $0x18] sm:$0xff]  ;;  %v18_v10 = vld [vmem:[%s1413_s0 + $0x20] sm:$0xff]  ;;  %v19_v12 = vld [vmem:[%s1413_s0 + $0x28] sm:$0xff] }
   0x5   :  { %766 = vmatmul.mubr.msk.f32.vlgmr.msra.gmra.mxu1 %vm71_vm1, %v39_v3  ;;  %v44_v13 = vld [vmem:[%s1413_s0 + $0xf0] sm:$0xff]  ;;  %v45_v15 = vld [vmem:[%s1413_s0 + $0xf8] sm:$0xff]  ;;  %v46_v17 = vld [vmem:[%s1413_s0 + $0x100] sm:$0xff] }
   0x6   :  { %768 = vmatprep.mubr.msk.f32.mxu1 %vm842_vm2, %v841_v0  ;;  %v20_v14 = vld [vmem:[%s1413_s0 + $0x30] sm:$0xff]  ;;  %v21_v16 = vld [vmem:[%s1413_s0 + $0x38] sm:$0xff]  ;;  %v22_v18 = vld [vmem:[%s1413_s0 + $0x40] sm:$0xff] }
   0x7   :  { %694 = vmatmul.mubr.msk.f32.gmra.mxu0 %vm71_vm1, %v15_v4  ;;  %v47_v19 = vld [vmem:[%s1413_s0 + $0x108] sm:$0xff]  ;;  %v48_v21 = vld [vmem:[%s1413_s0 + $0x110] sm:$0xff]  ;;  %v49_v23 = vld [vmem:[%s1413_s0 + $0x118] sm:$0xff] }
   0x8   :  { %696 = vmatprep.mubr.msk.f32.mxu0 %vm842_vm2, %v841_v0  ;;  %v23_v20 = vld [vmem:[%s1413_s0 + $0x48] sm:$0xff]  ;;  %v24_v22 = vld [vmem:[%s1413_s0 + $0x50] sm:$0xff]  ;;  %v25_v24 = vld [vmem:[%s1413_s0 + $0x58] sm:$0xff] }
   0x9   :  { %769 = vmatmul.mubr.msk.f32.gmra.mxu1 %vm71_vm1, %v40_v5  ;;  %v50_v25 = vld [vmem:[%s1413_s0 + $0x120] sm:$0xff]  ;;  %v51_v27 = vld [vmem:[%s1413_s0 + $0x128] sm:$0xff]  ;;  %v52_v29 = vld [vmem:[%s1413_s0 + $0x130] sm:$0xff] }
   0xa   :  { %771 = vmatprep.mubr.msk.f32.mxu1 %vm842_vm2, %v841_v0  ;;  %v26_v26 = vld [vmem:[%s1413_s0 + $0x60] sm:$0xff]  ;;  %v27_v28 = vld [vmem:[%s1413_s0 + $0x68] sm:$0xff]  ;;  %v28_v30 = vld [vmem:[%s1413_s0 + $0x70] sm:$0xff] }
   0xb   :  { %697 = vmatmul.mubr.msk.f32.gmra.mxu0 %vm71_vm1, %v16_v6  ;;  %v53_v31 = vld [vmem:[%s1413_s0 + $0x138] sm:$0xff]  ;;  %v54_v33 = vld [vmem:[%s1413_s0 + $0x140] sm:$0xff]  ;;  %v55_v35 = vld [vmem:[%s1413_s0 + $0x148] sm:$0xff] }
   0xc   :  { %699 = vmatprep.mubr.msk.f32.mxu0 %vm842_vm2, %v841_v0  ;;  %v29_v32 = vld [vmem:[%s1413_s0 + $0x78] sm:$0xff]  ;;  %v30_v34 = vld [vmem:[%s1413_s0 + $0x80] sm:$0xff]  ;;  %v31_v36 = vld [vmem:[%s1413_s0 + $0x88] sm:$0xff] }
   0xd   :  { %772 = vmatmul.mubr.msk.f32.gmra.mxu1 %vm71_vm1, %v41_v7  ;;  %v56_v37 = vld [vmem:[%s1413_s0 + $0x150] sm:$0xff]  ;;  %v57_v39 = vld [vmem:[%s1413_s0 + $0x158] sm:$0xff]  ;;  %v58_v41 = vld [vmem:[%s1413_s0 + $0x160] sm:$0xff] }
   0xe   :  { %774 = vmatprep.mubr.msk.f32.mxu1 %vm842_vm2, %v841_v0  ;;  %v32_v38 = vld [vmem:[%s1413_s0 + $0x90] sm:$0xff]  ;;  %v33_v40 = vld [vmem:[%s1413_s0 + $0x98] sm:$0xff]  ;;  %v34_v42 = vld [vmem:[%s1413_s0 + $0xa0] sm:$0xff] }
   0xf   :  { %700 = vmatmul.mubr.msk.f32.gmra.mxu0 %vm71_vm1, %v17_v8  ;;  %v59_v43 = vld [vmem:[%s1413_s0 + $0x168] sm:$0xff]  ;;  %v60_v45 = vld [vmem:[%s1413_s0 + $0x170] sm:$0xff]  ;;  %v61_v47 = vld [vmem:[%s1413_s0 + $0x178] sm:$0xff] }
  0x10   :  { %702 = vmatprep.mubr.msk.f32.mxu0 %vm842_vm2, %v841_v0  ;;  %v35_v44 = vld [vmem:[%s1413_s0 + $0xa8] sm:$0xff]  ;;  %v36_v46 = vld [vmem:[%s1413_s0 + $0xb0] sm:$0xff]  ;;  %v37_v48 = vld [vmem:[%s1413_s0 + $0xb8] sm:$0xff] }
  0x11   :  { %775 = vmatmul.mubr.msk.f32.gmra.mxu1 %vm71_vm1, %v42_v9  ;;  %v62_v49 = vld [vmem:[%s1413_s0 + $0x180] sm:$0xff] }
  0x12   :  { %777 = vmatprep.mubr.msk.f32.mxu1 %vm842_vm2, %v841_v0  ;;  %v38_v50 = vld [vmem:[%s1413_s0 + $0xc0] sm:$0xff] }
  0x13   :  { %703 = vmatmul.mubr.msk.f32.gmra.mxu0 %vm71_vm1, %v18_v10  ;;  %v1165_v51 = vld [vmem:[%s1414_s2] ss:$0 sm:$0xff] }
  0x14   :  { %705 = vmatprep.mubr.msk.f32.mxu0 %vm842_vm2, %v841_v0 }
  0x15   :  { %778 = vmatmul.mubr.msk.f32.gmra.mxu1 %vm71_vm1, %v43_v11 }
  0x16   :  { %780 = vmatprep.mubr.msk.f32.mxu1 %vm842_vm2, %v841_v0 }
  0x17   :  { %706 = vmatmul.mubr.msk.f32.gmra.mxu0 %vm71_vm1, %v19_v12 }
  0x18   :  { %708 = vmatprep.mubr.msk.f32.mxu0 %vm842_vm2, %v841_v0 }
  0x19   :  { %781 = vmatmul.mubr.msk.f32.gmra.mxu1 %vm71_vm1, %v44_v13 }
  0x1a   :  { %783 = vmatprep.mubr.msk.f32.mxu1 %vm842_vm2, %v841_v0 }
  0x1b   :  { %709 = vmatmul.mubr.msk.f32.gmra.mxu0 %vm71_vm1, %v20_v14 }
  0x1c   :  { %711 = vmatprep.mubr.msk.f32.mxu0 %vm842_vm2, %v841_v0 }
  0x1d   :  { %784 = vmatmul.mubr.msk.f32.gmra.mxu1 %vm71_vm1, %v45_v15 }
  0x1e   :  { %786 = vmatprep.mubr.msk.f32.mxu1 %vm842_vm2, %v841_v0 }
  0x1f   :  { %712 = vmatmul.mubr.msk.f32.gmra.mxu0 %vm71_vm1, %v21_v16 }
  0x20   :  { %714 = vmatprep.mubr.msk.f32.mxu0 %vm842_vm2, %v841_v0 }
  0x21   :  { %787 = vmatmul.mubr.msk.f32.gmra.mxu1 %vm71_vm1, %v46_v17 }
  0x22   :  { %789 = vmatprep.mubr.msk.f32.mxu1 %vm842_vm2, %v841_v0 }
  0x23   :  { %715 = vmatmul.mubr.msk.f32.gmra.mxu0 %vm71_vm1, %v22_v18 }
  0x24   :  { %717 = vmatprep.mubr.msk.f32.mxu0 %vm842_vm2, %v841_v0 }
  0x25   :  { %790 = vmatmul.mubr.msk.f32.gmra.mxu1 %vm71_vm1, %v47_v19 }
  0x26   :  { %792 = vmatprep.mubr.msk.f32.mxu1 %vm842_vm2, %v841_v0 }
  0x27   :  { %718 = vmatmul.mubr.msk.f32.gmra.mxu0 %vm71_vm1, %v23_v20 }
  0x28   :  { %720 = vmatprep.mubr.msk.f32.mxu0 %vm842_vm2, %v841_v0 }
  0x29   :  { %793 = vmatmul.mubr.msk.f32.gmra.mxu1 %vm71_vm1, %v48_v21 }
  0x2a   :  { %795 = vmatprep.mubr.msk.f32.mxu1 %vm842_vm2, %v841_v0 }
  0x2b   :  { %721 = vmatmul.mubr.msk.f32.gmra.mxu0 %vm71_vm1, %v24_v22 }
  0x2c   :  { %723 = vmatprep.mubr.msk.f32.mxu0 %vm842_vm2, %v841_v0 }
  0x2d   :  { %796 = vmatmul.mubr.msk.f32.gmra.mxu1 %vm71_vm1, %v49_v23 }
  0x2e   :  { %798 = vmatprep.mubr.msk.f32.mxu1 %vm842_vm2, %v841_v0 }
  0x2f   :  { %724 = vmatmul.mubr.msk.f32.gmra.mxu0 %vm71_vm1, %v25_v24 }
  0x30   :  { %726 = vmatprep.mubr.msk.f32.mxu0 %vm842_vm2, %v841_v0 }
  0x31   :  { %799 = vmatmul.mubr.msk.f32.gmra.mxu1 %vm71_vm1, %v50_v25 }
  0x32   :  { %801 = vmatprep.mubr.msk.f32.mxu1 %vm842_vm2, %v841_v0 }
  0x33   :  { %727 = vmatmul.mubr.msk.f32.gmra.mxu0 %vm71_vm1, %v26_v26 }
  0x34   :  { %729 = vmatprep.mubr.msk.f32.mxu0 %vm842_vm2, %v841_v0 }
  0x35   :  { %802 = vmatmul.mubr.msk.f32.gmra.mxu1 %vm71_vm1, %v51_v27 }
  0x36   :  { %804 = vmatprep.mubr.msk.f32.mxu1 %vm842_vm2, %v841_v0 }
  0x37   :  { %730 = vmatmul.mubr.msk.f32.gmra.mxu0 %vm71_vm1, %v27_v28 }
  0x38   :  { %732 = vmatprep.mubr.msk.f32.mxu0 %vm842_vm2, %v841_v0 }
  0x39   :  { %805 = vmatmul.mubr.msk.f32.gmra.mxu1 %vm71_vm1, %v52_v29 }
  0x3a   :  { %807 = vmatprep.mubr.msk.f32.mxu1 %vm842_vm2, %v841_v0 }
  0x3b   :  { %733 = vmatmul.mubr.msk.f32.gmra.mxu0 %vm71_vm1, %v28_v30 }
  0x3c   :  { %735 = vmatprep.mubr.msk.f32.mxu0 %vm842_vm2, %v841_v0 }
  0x3d   :  { %808 = vmatmul.mubr.msk.f32.gmra.mxu1 %vm71_vm1, %v53_v31 }
  0x3e   :  { %810 = vmatprep.mubr.msk.f32.mxu1 %vm842_vm2, %v841_v0 }
  0x3f   :  { %736 = vmatmul.mubr.msk.f32.gmra.mxu0 %vm71_vm1, %v29_v32 }
  0x40   :  { %738 = vmatprep.mubr.msk.f32.mxu0 %vm842_vm2, %v841_v0 }
  0x41   :  { %811 = vmatmul.mubr.msk.f32.gmra.mxu1 %vm71_vm1, %v54_v33 }
  0x42   :  { %813 = vmatprep.mubr.msk.f32.mxu1 %vm842_vm2, %v841_v0 }
  0x43   :  { %739 = vmatmul.mubr.msk.f32.gmra.mxu0 %vm71_vm1, %v30_v34 }
  0x44   :  { %741 = vmatprep.mubr.msk.f32.mxu0 %vm842_vm2, %v841_v0 }
  0x45   :  { %814 = vmatmul.mubr.msk.f32.gmra.mxu1 %vm71_vm1, %v55_v35 }
  0x46   :  { %816 = vmatprep.mubr.msk.f32.mxu1 %vm842_vm2, %v841_v0 }
  0x47   :  { %742 = vmatmul.mubr.msk.f32.gmra.mxu0 %vm71_vm1, %v31_v36 }
  0x48   :  { %744 = vmatprep.mubr.msk.f32.mxu0 %vm842_vm2, %v841_v0 }
  0x49   :  { %817 = vmatmul.mubr.msk.f32.gmra.mxu1 %vm71_vm1, %v56_v37 }
  0x4a   :  { %819 = vmatprep.mubr.msk.f32.mxu1 %vm842_vm2, %v841_v0 }
  0x4b   :  { %745 = vmatmul.mubr.msk.f32.gmra.mxu0 %vm71_vm1, %v32_v38 }
  0x4c   :  { %747 = vmatprep.mubr.msk.f32.mxu0 %vm842_vm2, %v841_v0 }
  0x4d   :  { %820 = vmatmul.mubr.msk.f32.gmra.mxu1 %vm71_vm1, %v57_v39 }
  0x4e   :  { %822 = vmatprep.mubr.msk.f32.mxu1 %vm842_vm2, %v841_v0 }
  0x4f   :  { %748 = vmatmul.mubr.msk.f32.gmra.mxu0 %vm71_vm1, %v33_v40 }
  0x50   :  { %750 = vmatprep.mubr.msk.f32.mxu0 %vm842_vm2, %v841_v0 }
  0x51   :  { %823 = vmatmul.mubr.msk.f32.gmra.mxu1 %vm71_vm1, %v58_v41 }
  0x52   :  { %825 = vmatprep.mubr.msk.f32.mxu1 %vm842_vm2, %v841_v0 }
  0x53   :  { %751 = vmatmul.mubr.msk.f32.gmra.mxu0 %vm71_vm1, %v34_v42 }
  0x54   :  { %753 = vmatprep.mubr.msk.f32.mxu0 %vm842_vm2, %v841_v0 }
  0x55   :  { %826 = vmatmul.mubr.msk.f32.gmra.mxu1 %vm71_vm1, %v59_v43 }
  0x56   :  { %828 = vmatprep.mubr.msk.f32.mxu1 %vm842_vm2, %v841_v0 }
  0x57   :  { %754 = vmatmul.mubr.msk.f32.gmra.mxu0 %vm71_vm1, %v35_v44 }
  0x58   :  { %756 = vmatprep.mubr.msk.f32.mxu0 %vm842_vm2, %v841_v0 }
  0x59   :  { %829 = vmatmul.mubr.msk.f32.gmra.mxu1 %vm71_vm1, %v60_v45 }
  0x5a   :  { %831 = vmatprep.mubr.msk.f32.mxu1 %vm842_vm2, %v841_v0 }
  0x5b   :  { %757 = vmatmul.mubr.msk.f32.gmra.mxu0 %vm71_vm1, %v36_v46 }
  0x5c   :  { %759 = vmatprep.mubr.msk.f32.mxu0 %vm842_vm2, %v841_v0 }
  0x5d   :  { %832 = vmatmul.mubr.msk.f32.gmra.mxu1 %vm71_vm1, %v61_v47 }
  0x5e   :  { %834 = vmatprep.mubr.msk.f32.mxu1 %vm842_vm2, %v841_v0 }
  0x5f   :  { %760 = vmatmul.mubr.msk.f32.gmra.mxu0 %vm71_vm1, %v37_v48 }
  0x60   :  { %762 = vmatprep.mubr.msk.f32.mxu0 %vm842_vm2, %v841_v0 }
  0x61   :  { %835 = vmatmul.mubr.msk.f32.gmra.mxu1 %vm71_vm1, %v62_v49 }
  0x63   :  { %763 = vmatmul.mubr.msk.f32.gmra.mxu0 %vm71_vm1, %v38_v50 }
  0xc3   :  { %v289_v52 = vpop.f32.mrf.mxu0 }
  0xc4   :  { %v290_v53 = vadd.f32 %v1165_v51, %v289_v52 }
  0xc5   :  { %v692_v54 = vpop.f32.mrf.mxu0  ;;  %v414_v55 = vpop.f32.mrf.mxu1 }
  0xc6   :  { %534 = vst.msk [vmem:[%s1415_s3] sm:$0xff] %vm533_vm3, %v290_v53  ;;  %v415_v56 = vadd.f32 %v1165_v51, %v414_v55 }
  0xc7   :  { %v294_v57 = vpop.f32.mrf.mxu0  ;;  %v767_v58 = vpop.f32.mrf.mxu1 }
  0xc8   :  { %559 = vst.msk [vmem:[%s1415_s3 + $0xc8] sm:$0xff] %vm533_vm3, %v415_v56  ;;  %v295_v59 = vadd.f32 %v1165_v51, %v294_v57 }
  0xc9   :  { %v695_v60 = vpop.f32.mrf.mxu0  ;;  %v419_v61 = vpop.f32.mrf.mxu1 }
  0xca   :  { %535 = vst.msk [vmem:[%s1415_s3 + $0x8] sm:$0xff] %vm533_vm3, %v295_v59  ;;  %v420_v62 = vadd.f32 %v1165_v51, %v419_v61 }
  0xcb   :  { %v299_v63 = vpop.f32.mrf.mxu0  ;;  %v770_v0 = vpop.f32.mrf.mxu1 }
  0xcc   :  { %560 = vst.msk [vmem:[%s1415_s3 + $0xd0] sm:$0xff] %vm533_vm3, %v420_v62  ;;  %v300_v1 = vadd.f32 %v1165_v51, %v299_v63 }
  0xcd   :  { %v698_v2 = vpop.f32.mrf.mxu0  ;;  %v424_v3 = vpop.f32.mrf.mxu1 }
  0xce   :  { %536 = vst.msk [vmem:[%s1415_s3 + $0x10] sm:$0xff] %vm533_vm3, %v300_v1  ;;  %v425_v4 = vadd.f32 %v1165_v51, %v424_v3 }
  0xcf   :  { %v304_v5 = vpop.f32.mrf.mxu0  ;;  %v773_v6 = vpop.f32.mrf.mxu1 }
  0xd0   :  { %561 = vst.msk [vmem:[%s1415_s3 + $0xd8] sm:$0xff] %vm533_vm3, %v425_v4  ;;  %v305_v7 = vadd.f32 %v1165_v51, %v304_v5 }
  0xd1   :  { %v701_v8 = vpop.f32.mrf.mxu0  ;;  %v429_v9 = vpop.f32.mrf.mxu1 }
  0xd2   :  { %537 = vst.msk [vmem:[%s1415_s3 + $0x18] sm:$0xff] %vm533_vm3, %v305_v7  ;;  %v430_v10 = vadd.f32 %v1165_v51, %v429_v9 }
  0xd3   :  { %v309_v11 = vpop.f32.mrf.mxu0  ;;  %v776_v12 = vpop.f32.mrf.mxu1 }
  0xd4   :  { %562 = vst.msk [vmem:[%s1415_s3 + $0xe0] sm:$0xff] %vm533_vm3, %v430_v10  ;;  %v310_v13 = vadd.f32 %v1165_v51, %v309_v11 }
  0xd5   :  { %v704_v14 = vpop.f32.mrf.mxu0  ;;  %v434_v15 = vpop.f32.mrf.mxu1 }
  0xd6   :  { %538 = vst.msk [vmem:[%s1415_s3 + $0x20] sm:$0xff] %vm533_vm3, %v310_v13  ;;  %v435_v16 = vadd.f32 %v1165_v51, %v434_v15 }
  0xd7   :  { %v314_v17 = vpop.f32.mrf.mxu0  ;;  %v779_v18 = vpop.f32.mrf.mxu1 }
  0xd8   :  { %563 = vst.msk [vmem:[%s1415_s3 + $0xe8] sm:$0xff] %vm533_vm3, %v435_v16  ;;  %v315_v19 = vadd.f32 %v1165_v51, %v314_v17 }
  0xd9   :  { %v707_v20 = vpop.f32.mrf.mxu0  ;;  %v439_v21 = vpop.f32.mrf.mxu1 }
  0xda   :  { %539 = vst.msk [vmem:[%s1415_s3 + $0x28] sm:$0xff] %vm533_vm3, %v315_v19  ;;  %v440_v22 = vadd.f32 %v1165_v51, %v439_v21 }
  0xdb   :  { %v319_v23 = vpop.f32.mrf.mxu0  ;;  %v782_v24 = vpop.f32.mrf.mxu1 }
  0xdc   :  { %564 = vst.msk [vmem:[%s1415_s3 + $0xf0] sm:$0xff] %vm533_vm3, %v440_v22  ;;  %v320_v25 = vadd.f32 %v1165_v51, %v319_v23 }
  0xdd   :  { %v710_v26 = vpop.f32.mrf.mxu0  ;;  %v444_v27 = vpop.f32.mrf.mxu1 }
  0xde   :  { %540 = vst.msk [vmem:[%s1415_s3 + $0x30] sm:$0xff] %vm533_vm3, %v320_v25  ;;  %v445_v28 = vadd.f32 %v1165_v51, %v444_v27 }
  0xdf   :  { %v324_v29 = vpop.f32.mrf.mxu0  ;;  %v785_v30 = vpop.f32.mrf.mxu1 }
  0xe0   :  { %565 = vst.msk [vmem:[%s1415_s3 + $0xf8] sm:$0xff] %vm533_vm3, %v445_v28  ;;  %v325_v31 = vadd.f32 %v1165_v51, %v324_v29 }
  0xe1   :  { %v713_v32 = vpop.f32.mrf.mxu0  ;;  %v449_v33 = vpop.f32.mrf.mxu1 }
  0xe2   :  { %541 = vst.msk [vmem:[%s1415_s3 + $0x38] sm:$0xff] %vm533_vm3, %v325_v31  ;;  %v450_v34 = vadd.f32 %v1165_v51, %v449_v33 }
  0xe3   :  { %v329_v35 = vpop.f32.mrf.mxu0  ;;  %v788_v36 = vpop.f32.mrf.mxu1 }
  0xe4   :  { %566 = vst.msk [vmem:[%s1415_s3 + $0x100] sm:$0xff] %vm533_vm3, %v450_v34  ;;  %v330_v37 = vadd.f32 %v1165_v51, %v329_v35 }
  0xe5   :  { %v716_v38 = vpop.f32.mrf.mxu0  ;;  %v454_v39 = vpop.f32.mrf.mxu1 }
  0xe6   :  { %542 = vst.msk [vmem:[%s1415_s3 + $0x40] sm:$0xff] %vm533_vm3, %v330_v37  ;;  %v455_v40 = vadd.f32 %v1165_v51, %v454_v39 }
  0xe7   :  { %v334_v41 = vpop.f32.mrf.mxu0  ;;  %v791_v42 = vpop.f32.mrf.mxu1 }
  0xe8   :  { %567 = vst.msk [vmem:[%s1415_s3 + $0x108] sm:$0xff] %vm533_vm3, %v455_v40  ;;  %v335_v43 = vadd.f32 %v1165_v51, %v334_v41 }
  0xe9   :  { %v719_v44 = vpop.f32.mrf.mxu0  ;;  %v459_v45 = vpop.f32.mrf.mxu1 }
  0xea   :  { %543 = vst.msk [vmem:[%s1415_s3 + $0x48] sm:$0xff] %vm533_vm3, %v335_v43  ;;  %v460_v46 = vadd.f32 %v1165_v51, %v459_v45 }
  0xeb   :  { %v339_v47 = vpop.f32.mrf.mxu0  ;;  %v794_v48 = vpop.f32.mrf.mxu1 }
  0xec   :  { %568 = vst.msk [vmem:[%s1415_s3 + $0x110] sm:$0xff] %vm533_vm3, %v460_v46  ;;  %v340_v49 = vadd.f32 %v1165_v51, %v339_v47 }
  0xed   :  { %v722_v50 = vpop.f32.mrf.mxu0  ;;  %v464_v52 = vpop.f32.mrf.mxu1 }
  0xee   :  { %544 = vst.msk [vmem:[%s1415_s3 + $0x50] sm:$0xff] %vm533_vm3, %v340_v49  ;;  %v465_v53 = vadd.f32 %v1165_v51, %v464_v52 }
  0xef   :  { %v344_v54 = vpop.f32.mrf.mxu0  ;;  %v797_v55 = vpop.f32.mrf.mxu1 }
  0xf0   :  { %569 = vst.msk [vmem:[%s1415_s3 + $0x118] sm:$0xff] %vm533_vm3, %v465_v53  ;;  %v345_v56 = vadd.f32 %v1165_v51, %v344_v54 }
  0xf1   :  { %v725_v57 = vpop.f32.mrf.mxu0  ;;  %v469_v58 = vpop.f32.mrf.mxu1 }
  0xf2   :  { %545 = vst.msk [vmem:[%s1415_s3 + $0x58] sm:$0xff] %vm533_vm3, %v345_v56  ;;  %v470_v59 = vadd.f32 %v1165_v51, %v469_v58 }
  0xf3   :  { %v349_v60 = vpop.f32.mrf.mxu0  ;;  %v800_v61 = vpop.f32.mrf.mxu1 }
  0xf4   :  { %570 = vst.msk [vmem:[%s1415_s3 + $0x120] sm:$0xff] %vm533_vm3, %v470_v59  ;;  %v350_v62 = vadd.f32 %v1165_v51, %v349_v60 }
  0xf5   :  { %v728_v63 = vpop.f32.mrf.mxu0  ;;  %v474_v0 = vpop.f32.mrf.mxu1 }
  0xf6   :  { %546 = vst.msk [vmem:[%s1415_s3 + $0x60] sm:$0xff] %vm533_vm3, %v350_v62  ;;  %v475_v1 = vadd.f32 %v1165_v51, %v474_v0 }
  0xf7   :  { %v354_v2 = vpop.f32.mrf.mxu0  ;;  %v803_v3 = vpop.f32.mrf.mxu1 }
  0xf8   :  { %571 = vst.msk [vmem:[%s1415_s3 + $0x128] sm:$0xff] %vm533_vm3, %v475_v1  ;;  %v355_v4 = vadd.f32 %v1165_v51, %v354_v2 }
  0xf9   :  { %v731_v5 = vpop.f32.mrf.mxu0  ;;  %v479_v6 = vpop.f32.mrf.mxu1 }
  0xfa   :  { %547 = vst.msk [vmem:[%s1415_s3 + $0x68] sm:$0xff] %vm533_vm3, %v355_v4  ;;  %v480_v7 = vadd.f32 %v1165_v51, %v479_v6 }
  0xfb   :  { %v359_v8 = vpop.f32.mrf.mxu0  ;;  %v806_v9 = vpop.f32.mrf.mxu1 }
  0xfc   :  { %572 = vst.msk [vmem:[%s1415_s3 + $0x130] sm:$0xff] %vm533_vm3, %v480_v7  ;;  %v360_v10 = vadd.f32 %v1165_v51, %v359_v8 }
  0xfd   :  { %v734_v11 = vpop.f32.mrf.mxu0  ;;  %v484_v12 = vpop.f32.mrf.mxu1 }
  0xfe   :  { %548 = vst.msk [vmem:[%s1415_s3 + $0x70] sm:$0xff] %vm533_vm3, %v360_v10  ;;  %v485_v13 = vadd.f32 %v1165_v51, %v484_v12 }
  0xff   :  { %v364_v14 = vpop.f32.mrf.mxu0  ;;  %v809_v15 = vpop.f32.mrf.mxu1 }
 0x100   :  { %573 = vst.msk [vmem:[%s1415_s3 + $0x138] sm:$0xff] %vm533_vm3, %v485_v13  ;;  %v365_v16 = vadd.f32 %v1165_v51, %v364_v14 }
 0x101   :  { %v737_v17 = vpop.f32.mrf.mxu0  ;;  %v489_v18 = vpop.f32.mrf.mxu1 }
 0x102   :  { %549 = vst.msk [vmem:[%s1415_s3 + $0x78] sm:$0xff] %vm533_vm3, %v365_v16  ;;  %v490_v19 = vadd.f32 %v1165_v51, %v489_v18 }
 0x103   :  { %v369_v20 = vpop.f32.mrf.mxu0  ;;  %v812_v21 = vpop.f32.mrf.mxu1 }
 0x104   :  { %574 = vst.msk [vmem:[%s1415_s3 + $0x140] sm:$0xff] %vm533_vm3, %v490_v19  ;;  %v370_v22 = vadd.f32 %v1165_v51, %v369_v20 }
 0x105   :  { %v740_v23 = vpop.f32.mrf.mxu0  ;;  %v494_v24 = vpop.f32.mrf.mxu1 }
 0x106   :  { %550 = vst.msk [vmem:[%s1415_s3 + $0x80] sm:$0xff] %vm533_vm3, %v370_v22  ;;  %v495_v25 = vadd.f32 %v1165_v51, %v494_v24 }
 0x107   :  { %v374_v26 = vpop.f32.mrf.mxu0  ;;  %v815_v27 = vpop.f32.mrf.mxu1 }
 0x108   :  { %575 = vst.msk [vmem:[%s1415_s3 + $0x148] sm:$0xff] %vm533_vm3, %v495_v25  ;;  %v375_v28 = vadd.f32 %v1165_v51, %v374_v26 }
 0x109   :  { %v743_v29 = vpop.f32.mrf.mxu0  ;;  %v499_v30 = vpop.f32.mrf.mxu1 }
 0x10a   :  { %551 = vst.msk [vmem:[%s1415_s3 + $0x88] sm:$0xff] %vm533_vm3, %v375_v28  ;;  %v500_v31 = vadd.f32 %v1165_v51, %v499_v30 }
 0x10b   :  { %v379_v32 = vpop.f32.mrf.mxu0  ;;  %v818_v33 = vpop.f32.mrf.mxu1 }
 0x10c   :  { %576 = vst.msk [vmem:[%s1415_s3 + $0x150] sm:$0xff] %vm533_vm3, %v500_v31  ;;  %v380_v34 = vadd.f32 %v1165_v51, %v379_v32 }
 0x10d   :  { %v746_v35 = vpop.f32.mrf.mxu0  ;;  %v504_v36 = vpop.f32.mrf.mxu1 }
 0x10e   :  { %552 = vst.msk [vmem:[%s1415_s3 + $0x90] sm:$0xff] %vm533_vm3, %v380_v34  ;;  %v505_v37 = vadd.f32 %v1165_v51, %v504_v36 }
 0x10f   :  { %v384_v38 = vpop.f32.mrf.mxu0  ;;  %v821_v39 = vpop.f32.mrf.mxu1 }
 0x110   :  { %577 = vst.msk [vmem:[%s1415_s3 + $0x158] sm:$0xff] %vm533_vm3, %v505_v37  ;;  %v385_v40 = vadd.f32 %v1165_v51, %v384_v38 }
 0x111   :  { %v749_v41 = vpop.f32.mrf.mxu0  ;;  %v509_v42 = vpop.f32.mrf.mxu1 }
 0x112   :  { %553 = vst.msk [vmem:[%s1415_s3 + $0x98] sm:$0xff] %vm533_vm3, %v385_v40  ;;  %v510_v43 = vadd.f32 %v1165_v51, %v509_v42 }
 0x113   :  { %v389_v44 = vpop.f32.mrf.mxu0  ;;  %v824_v45 = vpop.f32.mrf.mxu1 }
 0x114   :  { %578 = vst.msk [vmem:[%s1415_s3 + $0x160] sm:$0xff] %vm533_vm3, %v510_v43  ;;  %v390_v46 = vadd.f32 %v1165_v51, %v389_v44 }
 0x115   :  { %v752_v47 = vpop.f32.mrf.mxu0  ;;  %v514_v48 = vpop.f32.mrf.mxu1 }
 0x116   :  { %554 = vst.msk [vmem:[%s1415_s3 + $0xa0] sm:$0xff] %vm533_vm3, %v390_v46  ;;  %v515_v49 = vadd.f32 %v1165_v51, %v514_v48 }
 0x117   :  { %v394_v50 = vpop.f32.mrf.mxu0  ;;  %v827_v52 = vpop.f32.mrf.mxu1 }
 0x118   :  { %579 = vst.msk [vmem:[%s1415_s3 + $0x168] sm:$0xff] %vm533_vm3, %v515_v49  ;;  %v395_v53 = vadd.f32 %v1165_v51, %v394_v50 }
 0x119   :  { %v755_v54 = vpop.f32.mrf.mxu0  ;;  %v519_v55 = vpop.f32.mrf.mxu1 }
 0x11a   :  { %555 = vst.msk [vmem:[%s1415_s3 + $0xa8] sm:$0xff] %vm533_vm3, %v395_v53  ;;  %v520_v56 = vadd.f32 %v1165_v51, %v519_v55 }
 0x11b   :  { %v399_v57 = vpop.f32.mrf.mxu0  ;;  %v830_v58 = vpop.f32.mrf.mxu1 }
 0x11c   :  { %580 = vst.msk [vmem:[%s1415_s3 + $0x170] sm:$0xff] %vm533_vm3, %v520_v56  ;;  %v400_v59 = vadd.f32 %v1165_v51, %v399_v57 }
 0x11d   :  { %v758_v60 = vpop.f32.mrf.mxu0  ;;  %v524_v61 = vpop.f32.mrf.mxu1 }
 0x11e   :  { %556 = vst.msk [vmem:[%s1415_s3 + $0xb0] sm:$0xff] %vm533_vm3, %v400_v59  ;;  %v525_v62 = vadd.f32 %v1165_v51, %v524_v61 }
 0x11f   :  { %v404_v63 = vpop.f32.mrf.mxu0  ;;  %v833_v0 = vpop.f32.mrf.mxu1 }
 0x120   :  { %581 = vst.msk [vmem:[%s1415_s3 + $0x178] sm:$0xff] %vm533_vm3, %v525_v62  ;;  %v405_v1 = vadd.f32 %v1165_v51, %v404_v63 }
 0x121   :  { %v761_v2 = vpop.f32.mrf.mxu0  ;;  %v529_v3 = vpop.f32.mrf.mxu1 }
 0x122   :  { %557 = vst.msk [vmem:[%s1415_s3 + $0xb8] sm:$0xff] %vm533_vm3, %v405_v1  ;;  %v530_v4 = vadd.f32 %v1165_v51, %v529_v3 }
 0x123   :  { %v409_v5 = vpop.f32.mrf.mxu0  ;;  %v836_v6 = vpop.f32.mrf.mxu1 }
 0x124   :  { %582 = vst.msk [vmem:[%s1415_s3 + $0x180] sm:$0xff] %vm533_vm3, %v530_v4  ;;  %v410_v7 = vadd.f32 %v1165_v51, %v409_v5 }
 0x125   :  { %v764_v8 = vpop.f32.mrf.mxu0 }
 0x126   :  { %558 = vst.msk [vmem:[%s1415_s3 + $0xc0] sm:$0xff] %vm533_vm3, %v410_v7 }

</bundles_post_ra>
